<compile_context>
chip_gen: v7x
topology: tpu7x:2x2x1
jax: 0.10.0
libtpu: 0.0.40
codegen_flags: <defaults>
</compile_context>

<pallas_src>
import functools

import jax
import jax.numpy as jnp
import numpy as np
from jax.experimental import pallas as pl
from jax.experimental.pallas import tpu as pltpu

LANE = 128
MAX_BLOCK_ROWS = 1024  # 1024 x 128 x 4B = 512 KiB / block; 2x double-buffered
                       # input+output stays far below v7x's 32 MiB scoped VMEM.


def copy_kernel(x_ref, o_ref):
    # Whole tile resident in VMEM; single vectorized copy.
    o_ref[...] = x_ref[...]


def _pick_block_rows(rows):
    """Largest multiple-of-8 divisor of `rows` that is <= MAX_BLOCK_ROWS.

    Falls back to the full extent (always legal for BlockSpec) if none exists
    or if the array already fits in one block.
    """
    if rows <= MAX_BLOCK_ROWS:
        return rows
    for cand in range(MAX_BLOCK_ROWS, 0, -8):  # 1024, 1016, ..., 8
        if rows % cand == 0:
            return cand
    return rows


def _lane_dense_copy(flat2d):
    """Identity copy of a (rows, 128) lane-dense slab, row-tiled."""
    rows, lanes = flat2d.shape
    block_rows = _pick_block_rows(rows)
    grid = (rows // block_rows,)
    return pl.pallas_call(
        copy_kernel,
        out_shape=jax.ShapeDtypeStruct((rows, lanes), flat2d.dtype),
        grid_spec=pltpu.PrefetchScalarGridSpec(
            num_scalar_prefetch=0,
            grid=grid,
            in_specs=[pl.BlockSpec((block_rows, lanes), lambda i: (i, 0))],
            out_specs=pl.BlockSpec((block_rows, lanes), lambda i: (i, 0)),
        ),
        # Pure copy: let the output alias the (intermediate, donatable) input
        # buffer so HBM write traffic can be elided / done in place.
        input_output_aliases={0: 0},
        compiler_params=pltpu.CompilerParams(
            # v7x: shard row tiles across both TensorCores; no-op on v5e/v6e.
            dimension_semantics=("parallel",)
        ),
    )(flat2d)


def _full_block_copy(x2d):
    """Fallback when the flat payload is not a multiple of 128 elements."""
    n, feat = x2d.shape
    return pl.pallas_call(
        copy_kernel,
        out_shape=jax.ShapeDtypeStruct((n, feat), x2d.dtype),
        grid_spec=pltpu.PrefetchScalarGridSpec(
            num_scalar_prefetch=0,
            grid=(1,),
            # Block = full array extent -> (8,128) rule satisfied trivially.
            in_specs=[pl.BlockSpec((n, feat), lambda i: (0, 0))],
            out_specs=pl.BlockSpec((n, feat), lambda i: (0, 0)),
        ),
        input_output_aliases={0: 0},
        compiler_params=pltpu.CompilerParams(
            dimension_semantics=("arbitrary",)
        ),
    )(x2d)


@jax.jit
def mnist_feature_extractor(x):
    """Pallas equivalent of MNISTFeatureExtractor.forward (x.view(n, -1))."""
    n = x.shape[0]
    feat = int(np.prod(x.shape[1:]))
    total = n * feat
    # The reshape is layout-preserving (row-major) and metadata-only; it
    # matches torch's x.view(n, -1) exactly.
    if total % LANE == 0:
        # Lane-dense path: present a (total/128, 128) slab to the kernel so
        # every store is an unmasked full-lane vst.
        out = _lane_dense_copy(x.reshape(total // LANE, LANE))
        return out.reshape(n, feat)
    # Fallback for payloads that don't pack into 128 lanes evenly.
    return _full_block_copy(x.reshape(n, feat))


if __name__ == "__main__":
    key = jax.random.PRNGKey(0)

    # Primary demo shape: batch=2, channels=4, spatial=16x16.
    # total = 2*4*16*16 = 2048 = 16 * 128 -> lane-dense tiled path.
    x = jax.random.normal(key, (2, 4, 16, 16), dtype=jnp.float32)
    out = jax.block_until_ready(mnist_feature_extractor(x))
    ref = np.asarray(x).reshape(2, -1)
    assert out.shape == (2, 4 * 16 * 16), out.shape
    np.testing.assert_allclose(np.asarray(out), ref, rtol=0, atol=0)

    # MNIST-like shape exercising the fallback path: 2*784 = 1568, not a
    # multiple of 128.
    x2 = jax.random.normal(key, (2, 1, 28, 28), dtype=jnp.float32)
    out2 = jax.block_until_ready(mnist_feature_extractor(x2))
    ref2 = np.asarray(x2).reshape(2, -1)
    assert out2.shape == (2, 1 * 28 * 28), out2.shape
    np.testing.assert_allclose(np.asarray(out2), ref2, rtol=0, atol=0)

    print("KERNEL_OK")
</pallas_src>

<mosaic_0001>
module attributes {stable_mosaic.version = 11 : i64} {
  func.func @copy_kernel(%arg0: i32, %arg1: memref<16x128xf32, #tpu.memory_space<vmem>>, %arg2: memref<16x128xf32, #tpu.memory_space<vmem>>) attributes {dimension_semantics = [#tpu.dimension_semantics<parallel>], iteration_bounds = array<i64: 1>, scalar_prefetch = 0 : i64, scratch_operands = 0 : i64, tpu.core_type = #tpu.core_type<tc>, window_params = [{transform_indices = @transform_0, window_bounds = array<i64: 16, 128>}, {transform_indices = @transform_1, window_bounds = array<i64: 16, 128>}]} {
    %c0 = arith.constant 0 : index
    %c0_0 = arith.constant 0 : index
    %0 = vector.load %arg1[%c0, %c0_0] : memref<16x128xf32, #tpu.memory_space<vmem>>, vector<16x128xf32>
    %c0_1 = arith.constant 0 : index
    %c0_2 = arith.constant 0 : index
    %1 = vector.load %arg2[%c0_1, %c0_2] : memref<16x128xf32, #tpu.memory_space<vmem>>, vector<16x128xf32>
    tpu.vector_store %arg2[%c0_1, %c0_2], %0 {strides = array<i32>} : memref<16x128xf32, #tpu.memory_space<vmem>>, vector<16x128xf32>,
    return
  }
  func.func @transform_0(%arg0: i32) -> (i32, i32) {
    %c0_i32 = arith.constant 0 : i32
    %c0_i32_0 = arith.constant 0 : i32
    return %arg0, %c0_i32 : i32, i32
  }
  func.func @transform_1(%arg0: i32) -> (i32, i32) {
    %c0_i32 = arith.constant 0 : i32
    %c0_i32_0 = arith.constant 0 : i32
    return %arg0, %c0_i32 : i32, i32
  }
}

</mosaic_0001>

<bundles_post_ra>
// kernel: mnist_feature_extractor.1
= control target key start
LH: loop header
LB: loop body
LE: loop exit
PB: predicated region body
PF: predicated region fallthrough
CT: control target
= control target key end

     0   :  { %s38_s0 = inlined_call_operand.vmem [shape: f32[16,128], index: 0, kind: input, shape index: {}, may-alias: {0,1}]   ;;  %s39_s1 = inlined_call_operand.vmem [shape: f32[16,128], index: 1, kind: output, shape index: {}, may-alias: {0,1}]  }
   0x1   :  { %v8_v0 = vld [vmem:[%s38_s0] sm:$0xff]  ;;  %v9_v1 = vld [vmem:[%s38_s0 + $0x8] sm:$0xff] }
   0x2   :  { %10 = vst [vmem:[%s39_s1] sm:$0xff] %v8_v0  ;;  %11 = vst [vmem:[%s39_s1 + $0x8] sm:$0xff] %v9_v1 }

</bundles_post_ra>
